<compile_context>
chip_gen: v7x
topology: tpu7x:2x2x1
jax: 0.10.0
libtpu: 0.0.40
codegen_flags: <defaults>
</compile_context>

<pallas_src>
import functools

import jax
import jax.numpy as jnp
from jax.experimental import pallas as pl
from jax.experimental.pallas import tpu as pltpu

_LANE = 128


def _round_up(n: int, m: int) -> int:
    return ((n + m - 1) // m) * m


def _agent_forward_kernel(
    inv_tau_ref,                      # SMEM (1,) f32
    x_ref, g_ref,                     # VMEM (TB, IP), (TB, VP) f32
    enc_w1, enc_b1, enc_w2, enc_b2,   # bf16 weights, f32 biases (VMEM resident)
    msg_w, msg_b,
    dec_w1, dec_b1, dec_w2, dec_b2,
    message_ref, decoded_ref,         # VMEM (TB, VP), (TB, IP) f32
    *, vocab_size: int,
):
    bf16 = jnp.bfloat16
    x = x_ref[...]

    # ---- encoder: Linear -> ReLU -> Linear (bf16 MXU operands, f32 accum) ----
    h = jnp.dot(x.astype(bf16), enc_w1[...],
                preferred_element_type=jnp.float32) + enc_b1[...]
    h = jnp.maximum(h, 0.0)
    encoded = jnp.dot(h.astype(bf16), enc_w2[...],
                      preferred_element_type=jnp.float32) + enc_b2[...]

    # ---- message generator + gumbel softmax (hard=False), f32 math ----
    logits = jnp.dot(encoded.astype(bf16), msg_w[...],
                     preferred_element_type=jnp.float32) + msg_b[...]
    inv_tau = inv_tau_ref[0]
    y = (logits + g_ref[...]) * inv_tau
    if vocab_size < y.shape[-1]:
        # mask zero-padded vocab columns out of the softmax normalization
        col = jax.lax.broadcasted_iota(jnp.int32, y.shape, 1)
        y = jnp.where(col < vocab_size, y, -1e30)
    y_max = jnp.max(y, axis=-1, keepdims=True)
    e = jnp.exp(y - y_max)
    denom = jnp.sum(e, axis=-1, keepdims=True)
    message = e * pl.reciprocal(denom, approx=True)

    # ---- decoder: Linear -> ReLU -> Linear ----
    d = jnp.dot(message.astype(bf16), dec_w1[...],
                preferred_element_type=jnp.float32) + dec_b1[...]
    d = jnp.maximum(d, 0.0)
    decoded = jnp.dot(d.astype(bf16), dec_w2[...],
                      preferred_element_type=jnp.float32) + dec_b2[...]

    message_ref[...] = message.astype(message_ref.dtype)
    decoded_ref[...] = decoded.astype(decoded_ref.dtype)


@functools.partial(jax.jit, static_argnames=("batch_tile",))
def _agent_forward_jit(x, gumbel_noise, params, tau, batch_tile):
    B, input_size = x.shape
    hidden_size = params["enc_w1"].shape[1]
    vocab_size = params["msg_w"].shape[1]

    f32, bf16 = jnp.float32, jnp.bfloat16

    # Lane-dense padding of every feature axis; batch padded to the tile size.
    IP = _round_up(input_size, _LANE)
    HP = _round_up(hidden_size, _LANE)
    VP = _round_up(vocab_size, _LANE)
    TB = min(batch_tile, _round_up(B, 16))   # multiple of 16 (bf16 sublane packing)
    Bp = _round_up(B, TB)
    grid = (Bp // TB,)

    def pad2(a, rows, cols, dtype):
        out = jnp.zeros((rows, cols), dtype)
        return out.at[: a.shape[0], : a.shape[1]].set(a.astype(dtype))

    xp = pad2(x, Bp, IP, f32)
    gp = pad2(gumbel_noise, Bp, VP, f32)

    wp = (
        pad2(params["enc_w1"], IP, HP, bf16), pad2(params["enc_b1"], 1, HP, f32),
        pad2(params["enc_w2"], HP, HP, bf16), pad2(params["enc_b2"], 1, HP, f32),
        pad2(params["msg_w"], HP, VP, bf16), pad2(params["msg_b"], 1, VP, f32),
        pad2(params["dec_w1"], VP, HP, bf16), pad2(params["dec_b1"], 1, HP, f32),
        pad2(params["dec_w2"], HP, IP, bf16), pad2(params["dec_b2"], 1, IP, f32),
    )

    # SMEM scalar; tau is traced -> annealing never triggers a recompile.
    inv_tau = jnp.reshape(1.0 / jnp.asarray(tau, f32), (1,))

    def batch_spec(feat):
        return pl.BlockSpec((TB, feat), lambda i: (i, 0))

    def resident_spec(shape):
        # Same block index every grid step -> stays resident in VMEM (DMA'd once).
        return pl.BlockSpec(shape, lambda i: (0, 0))

    in_specs = [
        pl.BlockSpec(memory_space=pltpu.MemorySpace.SMEM),   # inv_tau
        batch_spec(IP),                                      # x
        batch_spec(VP),                                      # gumbel noise
        resident_spec((IP, HP)), resident_spec((1, HP)),     # enc_w1, enc_b1
        resident_spec((HP, HP)), resident_spec((1, HP)),     # enc_w2, enc_b2
        resident_spec((HP, VP)), resident_spec((1, VP)),     # msg_w, msg_b
        resident_spec((VP, HP)), resident_spec((1, HP)),     # dec_w1, dec_b1
        resident_spec((HP, IP)), resident_spec((1, IP)),     # dec_w2, dec_b2
    ]
    out_specs = (batch_spec(VP), batch_spec(IP))

    flops = 2 * Bp * (IP * HP + HP * HP + HP * VP + VP * HP + HP * IP)
    bytes_accessed = (
        xp.size * 4 + gp.size * 4
        + sum(int(a.size) * a.dtype.itemsize for a in wp)
        + Bp * VP * 4 + Bp * IP * 4
    )
    cost = pl.CostEstimate(flops=flops, transcendentals=Bp * VP,
                           bytes_accessed=bytes_accessed)

    kernel = functools.partial(_agent_forward_kernel, vocab_size=vocab_size)

    message_p, decoded_p = pl.pallas_call(
        kernel,
        grid=grid,
        out_shape=(
            jax.ShapeDtypeStruct((Bp, VP), f32),
            jax.ShapeDtypeStruct((Bp, IP), f32),
        ),
        in_specs=in_specs,
        out_specs=out_specs,
        compiler_params=pltpu.CompilerParams(
            dimension_semantics=("parallel",),   # dual-TC sharding on v7x
        ),
        cost_estimate=cost,
    )(inv_tau, xp, gp, *wp)

    return message_p[:B, :vocab_size], decoded_p[:B, :input_size]


def agent_forward(x, gumbel_noise, params, tau=1.0, batch_tile=128):
    """Pallas implementation of CompositionaLearningAgent.forward.

    x:            [B, input_size]  float32
    gumbel_noise: [B, vocab_size]  float32 (standard Gumbel samples)
    params:       dict of f32 weights (W as [in, out]) and biases ([1, out]).
    Returns (message [B, vocab_size], decoded [B, input_size]) in float32.
    """
    return _agent_forward_jit(x, gumbel_noise, params,
                              jnp.asarray(tau, jnp.float32), batch_tile)


def init_params(key, input_size, hidden_size, vocab_size):
    """Deterministic parameter init (PyTorch-Linear-style uniform bounds), f32."""
    ks = jax.random.split(key, 12)

    def linear(kw, kb, fan_in, fan_out):
        bound = 1.0 / jnp.sqrt(fan_in)
        w = jax.random.uniform(kw, (fan_in, fan_out), jnp.float32, -bound, bound)
        b = jax.random.uniform(kb, (1, fan_out), jnp.float32, -bound, bound)
        return w, b

    enc_w1, enc_b1 = linear(ks[0], ks[1], input_size, hidden_size)
    enc_w2, enc_b2 = linear(ks[2], ks[3], hidden_size, hidden_size)
    msg_w, msg_b = linear(ks[4], ks[5], hidden_size, vocab_size)
    dec_w1, dec_b1 = linear(ks[6], ks[7], vocab_size, hidden_size)
    dec_w2, dec_b2 = linear(ks[8], ks[9], hidden_size, input_size)
    return dict(
        enc_w1=enc_w1, enc_b1=enc_b1, enc_w2=enc_w2, enc_b2=enc_b2,
        msg_w=msg_w, msg_b=msg_b,
        dec_w1=dec_w1, dec_b1=dec_b1, dec_w2=dec_w2, dec_b2=dec_b2,
    )


def reference_forward(x, gumbel_noise, params, tau=1.0):
    """Pure-JAX f32 reference for correctness checking."""
    h = jnp.maximum(x @ params["enc_w1"] + params["enc_b1"], 0.0)
    encoded = h @ params["enc_w2"] + params["enc_b2"]
    logits = encoded @ params["msg_w"] + params["msg_b"]
    message = jax.nn.softmax((logits + gumbel_noise) / tau, axis=-1)
    d = jnp.maximum(message @ params["dec_w1"] + params["dec_b1"], 0.0)
    decoded = d @ params["dec_w2"] + params["dec_b2"]
    return message, decoded


# TODO(synk): Adam training step, SharedState versioning and the async peer
# propagation methods are host-side control flow, not kernel work.

if __name__ == "__main__":
    B, INPUT, HIDDEN, VOCAB = 8, 16, 32, 16
    TAU = 1.0

    key = jax.random.PRNGKey(0)
    k_params, k_x, k_gumbel = jax.random.split(key, 3)

    params = init_params(k_params, INPUT, HIDDEN, VOCAB)
    x = jax.random.normal(k_x, (B, INPUT), jnp.float32)
    # Gumbel noise for gumbel_softmax (sampled outside the kernel; glue).
    gumbel_noise = jax.random.gumbel(k_gumbel, (B, VOCAB), jnp.float32)

    message, decoded = agent_forward(x, gumbel_noise, params, tau=TAU)
    jax.block_until_ready((message, decoded))

    msg_ref, dec_ref = reference_forward(x, gumbel_noise, params, tau=TAU)
    assert message.shape == (B, VOCAB) and decoded.shape == (B, INPUT)
    # bf16 matmul operands + approx reciprocal -> relaxed tolerances vs f32 ref.
    assert jnp.allclose(message, msg_ref, atol=5e-2, rtol=5e-2)
    assert jnp.allclose(decoded, dec_ref, atol=5e-2, rtol=5e-2)
    # message rows sum to 1 (softmax; approx reciprocal -> ~1e-3 tolerance)
    assert jnp.allclose(jnp.sum(message, axis=-1), 1.0, atol=5e-3)

    print("KERNEL_OK")
</pallas_src>

<mosaic_0001>
module attributes {stable_mosaic.version = 11 : i64} {
  func.func @_agent_forward_kernel(%arg0: i32, %arg1: memref<1xf32, #tpu.memory_space<smem>>, %arg2: memref<16x128xf32, #tpu.memory_space<vmem>>, %arg3: memref<16x128xf32, #tpu.memory_space<vmem>>, %arg4: memref<128x128xbf16, #tpu.memory_space<vmem>>, %arg5: memref<1x128xf32, #tpu.memory_space<vmem>>, %arg6: memref<128x128xbf16, #tpu.memory_space<vmem>>, %arg7: memref<1x128xf32, #tpu.memory_space<vmem>>, %arg8: memref<128x128xbf16, #tpu.memory_space<vmem>>, %arg9: memref<1x128xf32, #tpu.memory_space<vmem>>, %arg10: memref<128x128xbf16, #tpu.memory_space<vmem>>, %arg11: memref<1x128xf32, #tpu.memory_space<vmem>>, %arg12: memref<128x128xbf16, #tpu.memory_space<vmem>>, %arg13: memref<1x128xf32, #tpu.memory_space<vmem>>, %arg14: memref<16x128xf32, #tpu.memory_space<vmem>>, %arg15: memref<16x128xf32, #tpu.memory_space<vmem>>) attributes {dimension_semantics = [#tpu.dimension_semantics<parallel>], iteration_bounds = array<i64: 1>, scalar_prefetch = 0 : i64, scratch_operands = 0 : i64, tpu.core_type = #tpu.core_type<tc>, window_params = [{transform_indices = @transform_0, window_bounds = array<i64: 1>}, {transform_indices = @transform_1, window_bounds = array<i64: 16, 128>}, {transform_indices = @transform_2, window_bounds = array<i64: 16, 128>}, {pipeline_mode = #tpu.pipeline_mode<synchronous>, transform_indices = @transform_3, window_bounds = array<i64: 128, 128>}, {pipeline_mode = #tpu.pipeline_mode<synchronous>, transform_indices = @transform_4, window_bounds = array<i64: 1, 128>}, {pipeline_mode = #tpu.pipeline_mode<synchronous>, transform_indices = @transform_5, window_bounds = array<i64: 128, 128>}, {pipeline_mode = #tpu.pipeline_mode<synchronous>, transform_indices = @transform_6, window_bounds = array<i64: 1, 128>}, {pipeline_mode = #tpu.pipeline_mode<synchronous>, transform_indices = @transform_7, window_bounds = array<i64: 128, 128>}, {pipeline_mode = #tpu.pipeline_mode<synchronous>, transform_indices = @transform_8, window_bounds = array<i64: 1, 128>}, {pipeline_mode = #tpu.pipeline_mode<synchronous>, transform_indices = @transform_9, window_bounds = array<i64: 128, 128>}, {pipeline_mode = #tpu.pipeline_mode<synchronous>, transform_indices = @transform_10, window_bounds = array<i64: 1, 128>}, {pipeline_mode = #tpu.pipeline_mode<synchronous>, transform_indices = @transform_11, window_bounds = array<i64: 128, 128>}, {pipeline_mode = #tpu.pipeline_mode<synchronous>, transform_indices = @transform_12, window_bounds = array<i64: 1, 128>}, {transform_indices = @transform_13, window_bounds = array<i64: 16, 128>}, {transform_indices = @transform_14, window_bounds = array<i64: 16, 128>}]} {
    %c0 = arith.constant 0 : index
    %c0_0 = arith.constant 0 : index
    %0 = vector.load %arg2[%c0, %c0_0] : memref<16x128xf32, #tpu.memory_space<vmem>>, vector<16x128xf32>
    %1 = arith.truncf %0 : vector<16x128xf32> to vector<16x128xbf16>
    %c0_1 = arith.constant 0 : index
    %c0_2 = arith.constant 0 : index
    %2 = vector.load %arg4[%c0_1, %c0_2] : memref<128x128xbf16, #tpu.memory_space<vmem>>, vector<128x128xbf16>
    %cst = arith.constant dense<0.000000e+00> : vector<16x128xf32>
    %3 = tpu.matmul %1, %2, %cst {dimension_numbers = #tpu.dot_dimension_numbers<[1], [0], [0], [1], [0, 0, 1, 1], [], []>} : vector<16x128xbf16>, vector<128x128xbf16>, vector<16x128xf32> -> vector<16x128xf32>
    %c0_3 = arith.constant 0 : index
    %c0_4 = arith.constant 0 : index
    %4 = vector.load %arg5[%c0_3, %c0_4] : memref<1x128xf32, #tpu.memory_space<vmem>>, vector<1x128xf32>
    %5 = vector.broadcast %4 : vector<1x128xf32> to vector<16x128xf32>
    %6 = arith.addf %3, %5 : vector<16x128xf32>
    %cst_5 = arith.constant 0.000000e+00 : f32
    %7 = vector.broadcast %cst_5 : f32 to vector<16x128xf32>
    %8 = arith.maximumf %6, %7 : vector<16x128xf32>
    %9 = arith.truncf %8 : vector<16x128xf32> to vector<16x128xbf16>
    %c0_6 = arith.constant 0 : index
    %c0_7 = arith.constant 0 : index
    %10 = vector.load %arg6[%c0_6, %c0_7] : memref<128x128xbf16, #tpu.memory_space<vmem>>, vector<128x128xbf16>
    %cst_8 = arith.constant dense<0.000000e+00> : vector<16x128xf32>
    %11 = tpu.matmul %9, %10, %cst_8 {dimension_numbers = #tpu.dot_dimension_numbers<[1], [0], [0], [1], [0, 0, 1, 1], [], []>} : vector<16x128xbf16>, vector<128x128xbf16>, vector<16x128xf32> -> vector<16x128xf32>
    %c0_9 = arith.constant 0 : index
    %c0_10 = arith.constant 0 : index
    %12 = vector.load %arg7[%c0_9, %c0_10] : memref<1x128xf32, #tpu.memory_space<vmem>>, vector<1x128xf32>
    %13 = vector.broadcast %12 : vector<1x128xf32> to vector<16x128xf32>
    %14 = arith.addf %11, %13 : vector<16x128xf32>
    %15 = arith.truncf %14 : vector<16x128xf32> to vector<16x128xbf16>
    %c0_11 = arith.constant 0 : index
    %c0_12 = arith.constant 0 : index
    %16 = vector.load %arg8[%c0_11, %c0_12] : memref<128x128xbf16, #tpu.memory_space<vmem>>, vector<128x128xbf16>
    %cst_13 = arith.constant dense<0.000000e+00> : vector<16x128xf32>
    %17 = tpu.matmul %15, %16, %cst_13 {dimension_numbers = #tpu.dot_dimension_numbers<[1], [0], [0], [1], [0, 0, 1, 1], [], []>} : vector<16x128xbf16>, vector<128x128xbf16>, vector<16x128xf32> -> vector<16x128xf32>
    %c0_14 = arith.constant 0 : index
    %c0_15 = arith.constant 0 : index
    %18 = vector.load %arg9[%c0_14, %c0_15] : memref<1x128xf32, #tpu.memory_space<vmem>>, vector<1x128xf32>
    %19 = vector.broadcast %18 : vector<1x128xf32> to vector<16x128xf32>
    %20 = arith.addf %17, %19 : vector<16x128xf32>
    %c0_16 = arith.constant 0 : index
    %21 = memref.load %arg1[%c0_16] : memref<1xf32, #tpu.memory_space<smem>>
    %c0_17 = arith.constant 0 : index
    %c0_18 = arith.constant 0 : index
    %22 = vector.load %arg3[%c0_17, %c0_18] : memref<16x128xf32, #tpu.memory_space<vmem>>, vector<16x128xf32>
    %23 = arith.addf %20, %22 : vector<16x128xf32>
    %24 = vector.broadcast %21 : f32 to vector<16x128xf32>
    %25 = arith.mulf %23, %24 : vector<16x128xf32>
    %26 = tpu.iota {dimensions = array<i32: 1>} : vector<16x128xi32>
    %c16_i32 = arith.constant 16 : i32
    %27 = vector.broadcast %c16_i32 : i32 to vector<16x128xi32>
    %28 = arith.cmpi slt, %26, %27 : vector<16x128xi32>
    %cst_19 = arith.constant -1.000000e+30 : f32
    %29 = vector.broadcast %cst_19 : f32 to vector<16x128xf32>
    %30 = arith.select %28, %25, %29 : vector<16x128xi1>, vector<16x128xf32>
    %cst_20 = arith.constant dense<0xFF800000> : vector<16xf32>
    %31 = vector.multi_reduction <maximumf>, %30, %cst_20 [1] : vector<16x128xf32> to vector<16xf32>
    %32 = vector.shape_cast %31 : vector<16xf32> to vector<16x1xf32>
    %33 = vector.broadcast %32 : vector<16x1xf32> to vector<16x128xf32>
    %34 = arith.subf %30, %33 : vector<16x128xf32>
    %35 = math.exp %34 : vector<16x128xf32>
    %cst_21 = arith.constant dense<0.000000e+00> : vector<16xf32>
    %36 = vector.multi_reduction <add>, %35, %cst_21 [1] : vector<16x128xf32> to vector<16xf32>
    %37 = vector.shape_cast %36 : vector<16xf32> to vector<16x1xf32>
    %38 = tpu.reciprocal %37 {approx = true} : vector<16x1xf32> -> vector<16x1xf32>
    %39 = vector.broadcast %38 : vector<16x1xf32> to vector<16x128xf32>
    %40 = arith.mulf %35, %39 : vector<16x128xf32>
    %41 = arith.truncf %40 : vector<16x128xf32> to vector<16x128xbf16>
    %c0_22 = arith.constant 0 : index
    %c0_23 = arith.constant 0 : index
    %42 = vector.load %arg10[%c0_22, %c0_23] : memref<128x128xbf16, #tpu.memory_space<vmem>>, vector<128x128xbf16>
    %cst_24 = arith.constant dense<0.000000e+00> : vector<16x128xf32>
    %43 = tpu.matmul %41, %42, %cst_24 {dimension_numbers = #tpu.dot_dimension_numbers<[1], [0], [0], [1], [0, 0, 1, 1], [], []>} : vector<16x128xbf16>, vector<128x128xbf16>, vector<16x128xf32> -> vector<16x128xf32>
    %c0_25 = arith.constant 0 : index
    %c0_26 = arith.constant 0 : index
    %44 = vector.load %arg11[%c0_25, %c0_26] : memref<1x128xf32, #tpu.memory_space<vmem>>, vector<1x128xf32>
    %45 = vector.broadcast %44 : vector<1x128xf32> to vector<16x128xf32>
    %46 = arith.addf %43, %45 : vector<16x128xf32>
    %cst_27 = arith.constant 0.000000e+00 : f32
    %47 = vector.broadcast %cst_27 : f32 to vector<16x128xf32>
    %48 = arith.maximumf %46, %47 : vector<16x128xf32>
    %49 = arith.truncf %48 : vector<16x128xf32> to vector<16x128xbf16>
    %c0_28 = arith.constant 0 : index
    %c0_29 = arith.constant 0 : index
    %50 = vector.load %arg12[%c0_28, %c0_29] : memref<128x128xbf16, #tpu.memory_space<vmem>>, vector<128x128xbf16>
    %cst_30 = arith.constant dense<0.000000e+00> : vector<16x128xf32>
    %51 = tpu.matmul %49, %50, %cst_30 {dimension_numbers = #tpu.dot_dimension_numbers<[1], [0], [0], [1], [0, 0, 1, 1], [], []>} : vector<16x128xbf16>, vector<128x128xbf16>, vector<16x128xf32> -> vector<16x128xf32>
    %c0_31 = arith.constant 0 : index
    %c0_32 = arith.constant 0 : index
    %52 = vector.load %arg13[%c0_31, %c0_32] : memref<1x128xf32, #tpu.memory_space<vmem>>, vector<1x128xf32>
    %53 = vector.broadcast %52 : vector<1x128xf32> to vector<16x128xf32>
    %54 = arith.addf %51, %53 : vector<16x128xf32>
    %c0_33 = arith.constant 0 : index
    %c0_34 = arith.constant 0 : index
    %55 = vector.load %arg14[%c0_33, %c0_34] : memref<16x128xf32, #tpu.memory_space<vmem>>, vector<16x128xf32>
    tpu.vector_store %arg14[%c0_33, %c0_34], %40 {strides = array<i32>} : memref<16x128xf32, #tpu.memory_space<vmem>>, vector<16x128xf32>,
    %c0_35 = arith.constant 0 : index
    %c0_36 = arith.constant 0 : index
    %56 = vector.load %arg15[%c0_35, %c0_36] : memref<16x128xf32, #tpu.memory_space<vmem>>, vector<16x128xf32>
    tpu.vector_store %arg15[%c0_35, %c0_36], %54 {strides = array<i32>} : memref<16x128xf32, #tpu.memory_space<vmem>>, vector<16x128xf32>,
    return
  }
  func.func @transform_0(%arg0: i32) -> i32 {
    %c0_i32 = arith.constant 0 : i32
    %c0_i32_0 = arith.constant 0 : i32
    return %c0_i32 : i32
  }
  func.func @transform_1(%arg0: i32) -> (i32, i32) {
    %c0_i32 = arith.constant 0 : i32
    %c0_i32_0 = arith.constant 0 : i32
    return %arg0, %c0_i32 : i32, i32
  }
  func.func @transform_2(%arg0: i32) -> (i32, i32) {
    %c0_i32 = arith.constant 0 : i32
    %c0_i32_0 = arith.constant 0 : i32
    return %arg0, %c0_i32 : i32, i32
  }
  func.func @transform_3(%arg0: i32) -> (i32, i32) {
    %c0_i32 = arith.constant 0 : i32
    %c0_i32_0 = arith.constant 0 : i32
    %c0_i32_1 = arith.constant 0 : i32
    return %c0_i32, %c0_i32_0 : i32, i32
  }
  func.func @transform_4(%arg0: i32) -> (i32, i32) {
    %c0_i32 = arith.constant 0 : i32
    %c0_i32_0 = arith.constant 0 : i32
    %c0_i32_1 = arith.constant 0 : i32
    return %c0_i32, %c0_i32_0 : i32, i32
  }
  func.func @transform_5(%arg0: i32) -> (i32, i32) {
    %c0_i32 = arith.constant 0 : i32
    %c0_i32_0 = arith.constant 0 : i32
    %c0_i32_1 = arith.constant 0 : i32
    return %c0_i32, %c0_i32_0 : i32, i32
  }
  func.func @transform_6(%arg0: i32) -> (i32, i32) {
    %c0_i32 = arith.constant 0 : i32
    %c0_i32_0 = arith.constant 0 : i32
    %c0_i32_1 = arith.constant 0 : i32
    return %c0_i32, %c0_i32_0 : i32, i32
  }
  func.func @transform_7(%arg0: i32) -> (i32, i32) {
    %c0_i32 = arith.constant 0 : i32
    %c0_i32_0 = arith.constant 0 : i32
    %c0_i32_1 = arith.constant 0 : i32
    return %c0_i32, %c0_i32_0 : i32, i32
  }
  func.func @transform_8(%arg0: i32) -> (i32, i32) {
    %c0_i32 = arith.constant 0 : i32
    %c0_i32_0 = arith.constant 0 : i32
    %c0_i32_1 = arith.constant 0 : i32
    return %c0_i32, %c0_i32_0 : i32, i32
  }
  func.func @transform_9(%arg0: i32) -> (i32, i32) {
    %c0_i32 = arith.constant 0 : i32
    %c0_i32_0 = arith.constant 0 : i32
    %c0_i32_1 = arith.constant 0 : i32
    return %c0_i32, %c0_i32_0 : i32, i32
  }
  func.func @transform_10(%arg0: i32) -> (i32, i32) {
    %c0_i32 = arith.constant 0 : i32
    %c0_i32_0 = arith.constant 0 : i32
    %c0_i32_1 = arith.constant 0 : i32
    return %c0_i32, %c0_i32_0 : i32, i32
  }
  func.func @transform_11(%arg0: i32) -> (i32, i32) {
    %c0_i32 = arith.constant 0 : i32
    %c0_i32_0 = arith.constant 0 : i32
    %c0_i32_1 = arith.constant 0 : i32
    return %c0_i32, %c0_i32_0 : i32, i32
  }
  func.func @transform_12(%arg0: i32) -> (i32, i32) {
    %c0_i32 = arith.constant 0 : i32
    %c0_i32_0 = arith.constant 0 : i32
    %c0_i32_1 = arith.constant 0 : i32
    return %c0_i32, %c0_i32_0 : i32, i32
  }
  func.func @transform_13(%arg0: i32) -> (i32, i32) {
    %c0_i32 = arith.constant 0 : i32
    %c0_i32_0 = arith.constant 0 : i32
    return %arg0, %c0_i32 : i32, i32
  }
  func.func @transform_14(%arg0: i32) -> (i32, i32) {
    %c0_i32 = arith.constant 0 : i32
    %c0_i32_0 = arith.constant 0 : i32
    return %arg0, %c0_i32 : i32, i32
  }
}

</mosaic_0001>

<bundles_post_ra>
// kernel: _agent_forward_jit.1
= control target key start
LH: loop header
LB: loop body
LE: loop exit
PB: predicated region body
PF: predicated region fallthrough
CT: control target
= control target key end

     0   :  { %v902_v0 = vmov 0.0   ;;  %vm903_vm0 = vmmov 0   ;;  %v399_v46 = vlaneseq  ;;  %s1191_s3 = inlined_call_operand.vmem [shape: bf16[128,128], index: 3, kind: input, shape index: {}]   ;;  %s1192_s5 = inlined_call_operand.vmem [shape: bf16[128,128], index: 5, kind: input, shape index: {}]   ;;  %s1193_s1 = inlined_call_operand.vmem [shape: f32[16,128], index: 1, kind: input, shape index: {}]   ;;  %s1194_s7 = inlined_call_operand.vmem [shape: bf16[128,128], index: 7, kind: input, shape index: {}]   ;;  %s1195_s4 = inlined_call_operand.vmem [shape: f32[1,128], index: 4, kind: input, shape index: {}]   ;;  %s1196_s6 = inlined_call_operand.vmem [shape: f32[1,128], index: 6, kind: input, shape index: {}]   ;;  %s1197_s8 = inlined_call_operand.vmem [shape: f32[1,128], index: 8, kind: input, shape index: {}]   ;;  %s1198_s2 = inlined_call_operand.vmem [shape: f32[16,128], index: 2, kind: input, shape index: {}]   ;;  %s1199_s0 = inlined_call_operand.<no memory space> [shape: f32[1], index: 0, kind: input, shape index: {}]   ;;  %s1200_s9 = inlined_call_operand.vmem [shape: bf16[128,128], index: 9, kind: input, shape index: {}]   ;;  %s1201_s11 = inlined_call_operand.vmem [shape: bf16[128,128], index: 11, kind: input, shape index: {}]   ;;  %s1202_s13 = inlined_call_operand.vmem [shape: f32[16,128], index: 13, kind: output, shape index: {0}]   ;;  %s1203_s10 = inlined_call_operand.vmem [shape: f32[1,128], index: 10, kind: input, shape index: {}]   ;;  %s1204_s12 = inlined_call_operand.vmem [shape: f32[1,128], index: 12, kind: input, shape index: {}]   ;;  %s1205_s14 = inlined_call_operand.vmem [shape: f32[16,128], index: 14, kind: output, shape index: {1}]  }
   0x1   :  { %752 = vmatprep.subr.bf16.mxu0 %v902_v0  ;;  %v854_v1 = vld [vmem:[%s1191_s3] sm:$0xff]   ;;  %768 = vmatprep.mubr.msk.bf16.mxu0 %vm903_vm0, %v902_v0  ;;  %v855_v2 = vld [vmem:[%s1191_s3 + $0x8] sm:$0xff]   ;;  %v856_v3 = vld [vmem:[%s1191_s3 + $0x10] sm:$0xff]   ;;  %v396_v55 = vstv %s1199_s0 }
   0x2   :  { %772 = vmatprep.subr.bf16.mxu1 %v902_v0  ;;  %788 = vmatprep.mubr.msk.bf16.mxu1 %vm903_vm0, %v902_v0  ;;  %v862_v4 = vld [vmem:[%s1192_s5] sm:$0xff]   ;;  %v857_v5 = vld [vmem:[%s1191_s3 + $0x18] sm:$0xff]   ;;  %v863_v6 = vld [vmem:[%s1192_s5 + $0x8] sm:$0xff]   ;;  %v400_v50 = vand.u32 127, %v399_v46 }
   0x3   :  { %753 = vmatpush3.bf16.msra.mxu0 %v854_v1  ;;  %773 = vmatpush3.bf16.msra.mxu1 %v862_v4  ;;  %v858_v7 = vld [vmem:[%s1191_s3 + $0x20] sm:$0xff]   ;;  %v864_v8 = vld [vmem:[%s1192_s5 + $0x10] sm:$0xff]   ;;  %v859_v9 = vld [vmem:[%s1191_s3 + $0x28] sm:$0xff]  }
   0x4   :  { %754 = vmatprep.subr.bf16.mxu0 %v902_v0  ;;  %774 = vmatprep.subr.bf16.mxu1 %v902_v0  ;;  %v865_v10 = vld [vmem:[%s1192_s5 + $0x18] sm:$0xff]   ;;  %v860_v11 = vld [vmem:[%s1191_s3 + $0x30] sm:$0xff]   ;;  %v866_v12 = vld [vmem:[%s1192_s5 + $0x20] sm:$0xff]   ;;  %vm401_vm1 = vcmp.lt.s32.totalorder %v400_v50, 16 }
   0x5   :  { %v861_v13 = vld [vmem:[%s1191_s3 + $0x38] sm:$0xff]   ;;  %v48_v14 = vld [vmem:[%s1193_s1] sm:$0xff]  ;;  %v49_v15 = vld [vmem:[%s1193_s1 + $0x8] sm:$0xff] }
   0x6   :  { %v867_v16 = vld [vmem:[%s1192_s5 + $0x28] sm:$0xff]   ;;  %v50_v17 = vpack.c.bf16 %v49_v15, %v48_v14  ;;  %v868_v18 = vld [vmem:[%s1192_s5 + $0x30] sm:$0xff]   ;;  %v869_v19 = vld [vmem:[%s1192_s5 + $0x38] sm:$0xff]  }
   0x7   :  { %755 = vmatpush3.bf16.msra.mxu0 %v855_v2  ;;  %775 = vmatpush3.bf16.msra.mxu1 %v863_v6  ;;  %v870_v20 = vld [vmem:[%s1194_s7] sm:$0xff]   ;;  %v871_v21 = vld [vmem:[%s1194_s7 + $0x8] sm:$0xff]   ;;  %v872_v22 = vld [vmem:[%s1194_s7 + $0x10] sm:$0xff]  }
   0x8   :  { %756 = vmatprep.subr.bf16.mxu0 %v902_v0  ;;  %776 = vmatprep.subr.bf16.mxu1 %v902_v0  ;;  %v873_v23 = vld [vmem:[%s1194_s7 + $0x18] sm:$0xff]   ;;  %v874_v24 = vld [vmem:[%s1194_s7 + $0x20] sm:$0xff]   ;;  %v875_v25 = vld [vmem:[%s1194_s7 + $0x28] sm:$0xff]  }
   0x9   :  { %v662_v26 = vld [vmem:[%s1195_s4] ss:$0 sm:$0xff]  ;;  %v876_v36 = vld [vmem:[%s1194_s7 + $0x30] sm:$0xff]   ;;  %v877_v37 = vld [vmem:[%s1194_s7 + $0x38] sm:$0xff]  }
   0xa   :  { %v671_v38 = vld [vmem:[%s1196_s6] ss:$0 sm:$0xff]  ;;  %v393_v54 = vld [vmem:[%s1198_s2 + $0x8] sm:$0xff]  ;;  %v884_v15 = vld [vmem:[%s1200_s9 + $0x30] sm:$0xff]  }
   0xb   :  { %757 = vmatpush3.bf16.msra.mxu0 %v856_v3  ;;  %777 = vmatpush3.bf16.msra.mxu1 %v864_v8  ;;  %v680_v47 = vld [vmem:[%s1197_s8] ss:$0 sm:$0xff]  ;;  %v879_v2 = vld [vmem:[%s1200_s9 + $0x8] sm:$0xff]   ;;  %v880_v3 = vld [vmem:[%s1200_s9 + $0x10] sm:$0xff]  }
   0xc   :  { %758 = vmatprep.subr.bf16.mxu0 %v902_v0  ;;  %778 = vmatprep.subr.bf16.mxu1 %v902_v0  ;;  %v392_v49 = vld [vmem:[%s1198_s2] sm:$0xff]  ;;  %v883_v14 = vld [vmem:[%s1200_s9 + $0x28] sm:$0xff]  }
   0xd   :  { %v878_v1 = vld [vmem:[%s1200_s9] sm:$0xff]  }
   0xf   :  { %759 = vmatpush3.bf16.msra.mxu0 %v857_v5  ;;  %779 = vmatpush3.bf16.msra.mxu1 %v865_v10 }
  0x10   :  { %760 = vmatprep.subr.bf16.mxu0 %v902_v0  ;;  %780 = vmatprep.subr.bf16.mxu1 %v902_v0 }
  0x13   :  { %761 = vmatpush3.bf16.msra.mxu0 %v858_v7  ;;  %781 = vmatpush3.bf16.msra.mxu1 %v866_v12  ;;  %v881_v12 = vld [vmem:[%s1200_s9 + $0x18] sm:$0xff]  }
  0x14   :  { %762 = vmatprep.subr.bf16.mxu0 %v902_v0  ;;  %782 = vmatprep.subr.bf16.mxu1 %v902_v0 }
  0x17   :  { %763 = vmatpush3.bf16.msra.mxu0 %v859_v9  ;;  %783 = vmatpush3.bf16.msra.mxu1 %v867_v16  ;;  %v885_v16 = vld [vmem:[%s1200_s9 + $0x38] sm:$0xff]  }
  0x18   :  { %764 = vmatprep.subr.bf16.mxu0 %v902_v0  ;;  %784 = vmatprep.subr.bf16.mxu1 %v902_v0 }
  0x1b   :  { %765 = vmatpush3.bf16.msra.mxu0 %v860_v11  ;;  %785 = vmatpush3.bf16.msra.mxu1 %v868_v18  ;;  %v887_v18 = vld [vmem:[%s1201_s11 + $0x8] sm:$0xff]  }
  0x1c   :  { %766 = vmatprep.subr.bf16.mxu0 %v902_v0  ;;  %786 = vmatprep.subr.bf16.mxu1 %v902_v0 }
  0x1f   :  { %767 = vmatpush3.bf16.msra.mxu0 %v861_v13  ;;  %787 = vmatpush3.bf16.msra.mxu1 %v869_v19  ;;  %v882_v13 = vld [vmem:[%s1200_s9 + $0x20] sm:$0xff]   ;;  %v888_v19 = vld [vmem:[%s1201_s11 + $0x10] sm:$0xff]  }
  0x20   :  { %792 = vmatprep.subr.bf16.mxu0 %v902_v0  ;;  %812 = vmatprep.subr.bf16.mxu1 %v902_v0 }
  0x22   :  { %769 = vmatmul.mubr.bf16.vlgmr.msra.gmra.mrb[0].mxu0 %v50_v17  ;;  %v886_v17 = vld [vmem:[%s1201_s11] sm:$0xff]  }
  0x23   :  { %808 = vmatprep.mubr.msk.bf16.mxu0 %vm903_vm0, %v902_v0  ;;  %793 = vmatpush3.bf16.msra.mxu0 %v870_v20  ;;  %v889_v20 = vld [vmem:[%s1201_s11 + $0x18] sm:$0xff]  }
  0x24   :  { %794 = vmatprep.subr.bf16.mxu0 %v902_v0 }
  0x27   :  { %795 = vmatpush3.bf16.msra.mxu0 %v871_v21  ;;  %v890_v21 = vld [vmem:[%s1201_s11 + $0x20] sm:$0xff]  }
  0x28   :  { %796 = vmatprep.subr.bf16.mxu0 %v902_v0 }
  0x2b   :  { %797 = vmatpush3.bf16.msra.mxu0 %v872_v22  ;;  %v891_v22 = vld [vmem:[%s1201_s11 + $0x28] sm:$0xff]  }
  0x2c   :  { %798 = vmatprep.subr.bf16.mxu0 %v902_v0 }
  0x2f   :  { %799 = vmatpush3.bf16.msra.mxu0 %v873_v23 }
  0x30   :  { %800 = vmatprep.subr.bf16.mxu0 %v902_v0 }
  0x33   :  { %801 = vmatpush3.bf16.msra.mxu0 %v874_v24 }
  0x34   :  { %802 = vmatprep.subr.bf16.mxu0 %v902_v0 }
  0x37   :  { %803 = vmatpush3.bf16.msra.mxu0 %v875_v25 }
  0x38   :  { %804 = vmatprep.subr.bf16.mxu0 %v902_v0 }
  0x3b   :  { %805 = vmatpush3.bf16.msra.mxu0 %v876_v36 }
  0x3c   :  { %806 = vmatprep.subr.bf16.mxu0 %v902_v0 }
  0x3f   :  { %807 = vmatpush3.bf16.msra.mxu0 %v877_v37 }
  0x40   :  { %832 = vmatprep.subr.bf16.mxu0 %v902_v0 }
  0xf5   :  { %v156_v27 = vpop.f32.mrb[0].mxu0 }
  0xf6   :  { %v157_v28 = vadd.f32 %v662_v26, %v156_v27  ;;  %v770_v29 = vpop.f32.mrb[1].mxu0 }
  0xf7   :  { %v159_v30 = vpop.f32.mrb[2].mxu0 }
  0xf8   :  { %v160_v31 = vadd.f32 %v662_v26, %v159_v30  ;;  %v771_v32 = vpop.f32.mrb[3].mxu0  ;;  %v163_v33 = vmax.f32 %v157_v28, 0.0  ;;  %v892_v30 = vld [vmem:[%s1201_s11 + $0x30] sm:$0xff]  }
  0xf9   :  { %v689_v32 = vld [vmem:[%s1203_s10] ss:$0 sm:$0xff] }
  0xfa   :  { %v164_v34 = vmax.f32 %v160_v31, 0.0  ;;  %v893_v31 = vld [vmem:[%s1201_s11 + $0x38] sm:$0xff]  }
  0xfc   :  { %v165_v35 = vpack.c.bf16 %v164_v34, %v163_v33 }
  0xfe   :  { %789 = vmatmul.mubr.bf16.vlgmr.msra.gmra.mrb[0].mxu1 %v165_v35 }
  0xff   :  { %828 = vmatprep.mubr.msk.bf16.mxu1 %vm903_vm0, %v902_v0  ;;  %813 = vmatpush3.bf16.msra.mxu1 %v878_v1 }
 0x100   :  { %814 = vmatprep.subr.bf16.mxu1 %v902_v0 }
 0x103   :  { %815 = vmatpush3.bf16.msra.mxu1 %v879_v2 }
 0x104   :  { %816 = vmatprep.subr.bf16.mxu1 %v902_v0 }
 0x107   :  { %817 = vmatpush3.bf16.msra.mxu1 %v880_v3 }
 0x108   :  { %818 = vmatprep.subr.bf16.mxu1 %v902_v0 }
 0x10b   :  { %819 = vmatpush3.bf16.msra.mxu1 %v881_v12 }
 0x10c   :  { %820 = vmatprep.subr.bf16.mxu1 %v902_v0 }
 0x10f   :  { %821 = vmatpush3.bf16.msra.mxu1 %v882_v13 }
 0x110   :  { %822 = vmatprep.subr.bf16.mxu1 %v902_v0 }
 0x113   :  { %823 = vmatpush3.bf16.msra.mxu1 %v883_v14 }
 0x114   :  { %824 = vmatprep.subr.bf16.mxu1 %v902_v0 }
 0x117   :  { %825 = vmatpush3.bf16.msra.mxu1 %v884_v15 }
 0x118   :  { %826 = vmatprep.subr.bf16.mxu1 %v902_v0 }
 0x11b   :  { %827 = vmatpush3.bf16.msra.mxu1 %v885_v16 }
 0x1d1   :  { %v271_v39 = vpop.f32.mrb[0].mxu1 }
 0x1d2   :  { %v790_v40 = vpop.f32.mrb[1].mxu1  ;;  %v272_v42 = vadd.f32 %v671_v38, %v271_v39 }
 0x1d3   :  { %v274_v41 = vpop.f32.mrb[2].mxu1 }
 0x1d4   :  { %v275_v43 = vadd.f32 %v671_v38, %v274_v41  ;;  %v791_v44 = vpop.f32.mrb[3].mxu1 }
 0x1d6   :  { %v278_v45 = vpack.c.bf16 %v275_v43, %v272_v42 }
 0x1d8   :  { %809 = vmatmul.mubr.bf16.vlgmr.msra.gmra.mrb[4].mxu0 %v278_v45 }
 0x1d9   :  { %848 = vmatprep.mubr.msk.bf16.mxu0 %vm903_vm0, %v902_v0  ;;  %833 = vmatpush3.bf16.msra.mxu0 %v886_v17 }
 0x1da   :  { %834 = vmatprep.subr.bf16.mxu0 %v902_v0 }
 0x1dd   :  { %835 = vmatpush3.bf16.msra.mxu0 %v887_v18 }
 0x1de   :  { %836 = vmatprep.subr.bf16.mxu0 %v902_v0 }
 0x1e1   :  { %837 = vmatpush3.bf16.msra.mxu0 %v888_v19 }
 0x1e2   :  { %838 = vmatprep.subr.bf16.mxu0 %v902_v0 }
 0x1e5   :  { %839 = vmatpush3.bf16.msra.mxu0 %v889_v20 }
 0x1e6   :  { %840 = vmatprep.subr.bf16.mxu0 %v902_v0 }
 0x1e9   :  { %841 = vmatpush3.bf16.msra.mxu0 %v890_v21 }
 0x1ea   :  { %842 = vmatprep.subr.bf16.mxu0 %v902_v0 }
 0x1ed   :  { %843 = vmatpush3.bf16.msra.mxu0 %v891_v22 }
 0x1ee   :  { %844 = vmatprep.subr.bf16.mxu0 %v902_v0 }
 0x1f1   :  { %845 = vmatpush3.bf16.msra.mxu0 %v892_v30 }
 0x1f2   :  { %846 = vmatprep.subr.bf16.mxu0 %v902_v0  ;;  %v698_v0 = vld [vmem:[%s1204_s12] ss:$0 sm:$0xff] }
 0x1f5   :  { %847 = vmatpush3.bf16.msra.mxu0 %v893_v31 }
 0x2ab   :  { %v384_v48 = vpop.f32.mrb[4].mxu0 }
 0x2ac   :  { %v385_v51 = vadd.f32 %v680_v47, %v384_v48  ;;  %v810_v52 = vpop.f32.mrb[5].mxu0 }
 0x2ad   :  { %v387_v53 = vpop.f32.mrb[6].mxu0 }
 0x2ae   :  { %v394_v56 = vadd.f32 %v392_v49, %v385_v51  ;;  %v388_v57 = vadd.f32 %v680_v47, %v387_v53  ;;  %v811_v58 = vpop.f32.mrb[7].mxu0 }
 0x2b0   :  { %v395_v59 = vadd.f32 %v393_v54, %v388_v57  ;;  %v397_v60 = vmul.f32 %v396_v55, %v394_v56 }
 0x2b2   :  { %v402_v61 = vsel %vm401_vm1, %v397_v60, -1e+30  ;;  %v398_v62 = vmul.f32 %v396_v55, %v395_v59 }
 0x2b3   :  { %404 = vmax.xlane.f32.xlu0 %v402_v61 }
 0x2b4   :  { %v403_v63 = vsel %vm401_vm1, %v398_v62, -1e+30 }
 0x2b7   :  { %406 = vmax.xlane.f32.xlu0 %v403_v63 }
 0x340   :  { %v405_v4 = vpop.xlane.xlu0 %404 }
 0x341   :  { %v408_v5 = vsub.f32 %v402_v61, %v405_v4 }
 0x343   :  { %v410_v6 = vmul.f32 1.442695, %v408_v5 }
 0x344   :  { %v407_v7 = vpop.xlane.xlu0 %406 }
 0x345   :  { %894 = vpow2.f32 %v410_v6  ;;  %v409_v8 = vsub.f32 %v403_v63, %v407_v7 }
 0x347   :  { %v412_v9 = vmul.f32 1.442695, %v409_v8 }
 0x349   :  { %896 = vpow2.f32 %v412_v9 }
 0x34f   :  { %v895_v10 = vpop.eup %894 }
 0x350   :  { %414 = vadd.xlane.f32.xlu1 %v895_v10 }
 0x353   :  { %v897_v11 = vpop.eup %896 }
 0x354   :  { %416 = vadd.xlane.f32.xlu1 %v897_v11 }
 0x3dd   :  { %v415_v23 = vpop.xlane.xlu1 %414 }
 0x3de   :  { %898 = vrcp.f32 %v415_v23 }
 0x3e1   :  { %v417_v24 = vpop.xlane.xlu1 %416 }
 0x3e2   :  { %900 = vrcp.f32 %v417_v24 }
 0x3e8   :  { %v899_v25 = vpop.eup %898 }
 0x3e9   :  { %v420_v26 = vmul.f32 %v899_v25, %v895_v10 }
 0x3eb   :  { %650 = vst [vmem:[%s1202_s13] sm:$0xff] %v420_v26 }
 0x3ec   :  { %v901_v27 = vpop.eup %900 }
 0x3ed   :  { %v421_v28 = vmul.f32 %v901_v27, %v897_v11 }
 0x3ef   :  { %v422_v29 = vpack.c.bf16 %v421_v28, %v420_v26  ;;  %651 = vst [vmem:[%s1202_s13 + $0x8] sm:$0xff] %v421_v28 }
 0x3f1   :  { %829 = vmatmul.mubr.bf16.vlgmr.msra.gmra.mrb[4].mxu1 %v422_v29 }
 0x4c4   :  { %v528_v33 = vpop.f32.mrb[4].mxu1 }
 0x4c5   :  { %v529_v34 = vadd.f32 %v689_v32, %v528_v33  ;;  %v830_v35 = vpop.f32.mrb[5].mxu1 }
 0x4c6   :  { %v531_v36 = vpop.f32.mrb[6].mxu1 }
 0x4c7   :  { %v532_v37 = vadd.f32 %v689_v32, %v531_v36  ;;  %v831_v38 = vpop.f32.mrb[7].mxu1  ;;  %v535_v39 = vmax.f32 %v529_v34, 0.0 }
 0x4c9   :  { %v536_v40 = vmax.f32 %v532_v37, 0.0 }
 0x4cb   :  { %v537_v41 = vpack.c.bf16 %v536_v40, %v535_v39 }
 0x4cd   :  { %849 = vmatmul.mubr.bf16.vlgmr.msra.gmra.mrb[8].mxu0 %v537_v41 }
 0x5a0   :  { %v643_v42 = vpop.f32.mrb[8].mxu0 }
 0x5a1   :  { %v644_v43 = vadd.f32 %v698_v0, %v643_v42  ;;  %v850_v44 = vpop.f32.mrb[9].mxu0 }
 0x5a2   :  { %v646_v45 = vpop.f32.mrb[10].mxu0 }
 0x5a3   :  { %652 = vst [vmem:[%s1205_s14] sm:$0xff] %v644_v43  ;;  %v647_v46 = vadd.f32 %v698_v0, %v646_v45  ;;  %v851_v47 = vpop.f32.mrb[11].mxu0 }
 0x5a5   :  { %653 = vst [vmem:[%s1205_s14 + $0x8] sm:$0xff] %v647_v46 }

</bundles_post_ra>
